<compile_context>
chip_gen: v6e
topology: v6e:2x2x1
jax: 0.10.0
libtpu: 0.0.40
codegen_flags: <defaults>
</compile_context>

<pallas_src>
import jax
import jax.numpy as jnp
from jax.experimental import pallas as pl
from jax.experimental.pallas import tpu as pltpu


def _softmax_axis0_kernel(x_ref, o_ref):
    """Stable softmax over axis 0 of the current (N, TILE_D) block."""
    x = x_ref[...].astype(jnp.float32)
    x_max = jnp.max(x, axis=0, keepdims=True)
    x_exp = jnp.exp(x - x_max)
    partition = jnp.sum(x_exp, axis=0, keepdims=True)
    inv = pl.reciprocal(partition, approx=False)  # exact: keep 1e-6 tolerance
    o_ref[...] = (x_exp * inv).astype(o_ref.dtype)


def _softmax_lastaxis_kernel(x_ref, o_ref):
    """Stable softmax over the lane axis of a (1, N) block (1-D input path)."""
    x = x_ref[...].astype(jnp.float32)
    x_max = jnp.max(x, axis=-1, keepdims=True)
    x_exp = jnp.exp(x - x_max)
    partition = jnp.sum(x_exp, axis=-1, keepdims=True)
    inv = pl.reciprocal(partition, approx=False)
    o_ref[...] = (x_exp * inv).astype(o_ref.dtype)


def _pick_tile_d(n, d, itemsize, max_tile=512, vmem_budget=12 << 20):
    """Lane-dense tile over the independent D axis, sized so double-buffered
    in+out tiles fit even the tightest scoped-VMEM defaults (v5e 16 MiB,
    v7x 32 MiB)."""
    if d <= max_tile or d % 128 != 0:
        # Full width: a block equal to the full array dim is always legal.
        return d
    tile = max_tile
    # 2 (double-buffer) x 2 (input + output) tiles must fit the budget.
    while tile > 128 and 2 * 2 * n * tile * itemsize > vmem_budget:
        tile //= 2
    return tile


def softmax_stable(data):
    """Softmax over axis 0, matching torch SoftmaxStable.forward."""
    orig_shape = data.shape

    if data.ndim == 1:
        # Lane-dense 1-D path: softmax over all elements, mapped onto lanes.
        x2d = data.reshape(1, -1)
        n, d = x2d.shape
        out = pl.pallas_call(
            _softmax_lastaxis_kernel,
            out_shape=jax.ShapeDtypeStruct((n, d), x2d.dtype),
            grid_spec=pltpu.PrefetchScalarGridSpec(
                num_scalar_prefetch=0,
                grid=(1,),
                in_specs=[pl.BlockSpec((n, d), lambda i: (0, 0))],
                out_specs=pl.BlockSpec((n, d), lambda i: (0, 0)),
            ),
            compiler_params=pltpu.CompilerParams(
                dimension_semantics=("arbitrary",),
            ),
            cost_estimate=pl.CostEstimate(
                flops=3 * n * d,
                transcendentals=n * d,
                bytes_accessed=2 * n * d * x2d.dtype.itemsize,
            ),
        )(x2d)
        return out.reshape(orig_shape)

    # ndim >= 2: collapse trailing dims; softmax stays over axis 0 and every
    # collapsed column is independent -> tile the lane (D) axis.
    x2d = data.reshape(data.shape[0], -1)
    n, d = x2d.shape
    tile_d = _pick_tile_d(n, d, x2d.dtype.itemsize)
    grid_d = pl.cdiv(d, tile_d)

    out = pl.pallas_call(
        _softmax_axis0_kernel,
        out_shape=jax.ShapeDtypeStruct((n, d), x2d.dtype),
        grid_spec=pltpu.PrefetchScalarGridSpec(
            num_scalar_prefetch=0,
            grid=(grid_d,),
            in_specs=[pl.BlockSpec((n, tile_d), lambda j: (0, j))],
            out_specs=pl.BlockSpec((n, tile_d), lambda j: (0, j)),
        ),
        compiler_params=pltpu.CompilerParams(
            # Columns are independent: shard across both TCs on v7x;
            # neutral on single-TC v5e/v6e.
            dimension_semantics=("parallel",),
        ),
        cost_estimate=pl.CostEstimate(
            flops=3 * n * d,
            transcendentals=n * d,
            bytes_accessed=2 * n * d * x2d.dtype.itemsize,
        ),
    )(x2d)
    return out.reshape(orig_shape)


def _ref_softmax_axis0(data):
    x_max = jnp.max(data, axis=0, keepdims=True)
    x_exp = jnp.exp(data - x_max)
    return x_exp / jnp.sum(x_exp, axis=0, keepdims=True)


if __name__ == "__main__":
    key = jax.random.PRNGKey(0)
    k0, k1, k2 = jax.random.split(key, 3)

    # Primary case: seq=8, hidden=32; softmax along axis 0 (seq).
    data = jax.random.normal(k0, (8, 32), dtype=jnp.float32)
    out = jax.block_until_ready(softmax_stable(data))
    ref = _ref_softmax_axis0(data)
    assert out.shape == data.shape
    assert jnp.allclose(out, ref, atol=1e-6, rtol=1e-6)
    assert jnp.allclose(jnp.sum(out, axis=0), jnp.ones((32,)), atol=1e-5)

    # 1-D path: now laid out (1, N) lane-dense, reduced over lanes.
    vec = jax.random.normal(k1, (32,), dtype=jnp.float32)
    out1 = jax.block_until_ready(softmax_stable(vec))
    ref1 = _ref_softmax_axis0(vec)
    assert out1.shape == vec.shape
    assert jnp.allclose(out1, ref1, atol=1e-6, rtol=1e-6)
    assert jnp.allclose(jnp.sum(out1), 1.0, atol=1e-5)

    # Tiled lane-axis path: D > TILE_D exercises the grid (incl. a padded
    # remainder tile — safe because columns are independent and OOB stores
    # are masked).
    wide = jax.random.normal(k2, (8, 640), dtype=jnp.float32)
    out2 = jax.block_until_ready(softmax_stable(wide))
    ref2 = _ref_softmax_axis0(wide)
    assert jnp.allclose(out2, ref2, atol=1e-6, rtol=1e-6)
    assert jnp.allclose(jnp.sum(out2, axis=0), jnp.ones((640,)), atol=1e-5)

    print("KERNEL_OK")
</pallas_src>

<mosaic_0001>
module attributes {stable_mosaic.version = 11 : i64} {
  func.func @_softmax_axis0_kernel(%arg0: i32, %arg1: memref<8x32xf32, #tpu.memory_space<vmem>>, %arg2: memref<8x32xf32, #tpu.memory_space<vmem>>) attributes {dimension_semantics = [#tpu.dimension_semantics<parallel>], iteration_bounds = array<i64: 1>, scalar_prefetch = 0 : i64, scratch_operands = 0 : i64, tpu.core_type = #tpu.core_type<tc>, window_params = [{transform_indices = @transform_0, window_bounds = array<i64: 8, 32>}, {transform_indices = @transform_1, window_bounds = array<i64: 8, 32>}]} {
    %c0 = arith.constant 0 : index
    %c0_0 = arith.constant 0 : index
    %0 = vector.load %arg1[%c0, %c0_0] : memref<8x32xf32, #tpu.memory_space<vmem>>, vector<8x32xf32>
    %cst = arith.constant dense<0xFF800000> : vector<32xf32>
    %1 = vector.multi_reduction <maximumf>, %0, %cst [0] : vector<8x32xf32> to vector<32xf32>
    %2 = vector.shape_cast %1 : vector<32xf32> to vector<1x32xf32>
    %3 = vector.broadcast %2 : vector<1x32xf32> to vector<8x32xf32>
    %4 = arith.subf %0, %3 : vector<8x32xf32>
    %5 = math.exp %4 : vector<8x32xf32>
    %cst_1 = arith.constant dense<0.000000e+00> : vector<32xf32>
    %6 = vector.multi_reduction <add>, %5, %cst_1 [0] : vector<8x32xf32> to vector<32xf32>
    %7 = vector.shape_cast %6 : vector<32xf32> to vector<1x32xf32>
    %8 = tpu.reciprocal %7 : vector<1x32xf32> -> vector<1x32xf32>
    %9 = vector.broadcast %8 : vector<1x32xf32> to vector<8x32xf32>
    %10 = arith.mulf %5, %9 : vector<8x32xf32>
    %c0_2 = arith.constant 0 : index
    %c0_3 = arith.constant 0 : index
    %11 = vector.load %arg2[%c0_2, %c0_3] : memref<8x32xf32, #tpu.memory_space<vmem>>, vector<8x32xf32>
    tpu.vector_store %arg2[%c0_2, %c0_3], %10 {strides = array<i32>} : memref<8x32xf32, #tpu.memory_space<vmem>>, vector<8x32xf32>,
    return
  }
  func.func @transform_0(%arg0: i32) -> (i32, i32) {
    %c0_i32 = arith.constant 0 : i32
    %c0_i32_0 = arith.constant 0 : i32
    return %c0_i32, %arg0 : i32, i32
  }
  func.func @transform_1(%arg0: i32) -> (i32, i32) {
    %c0_i32 = arith.constant 0 : i32
    %c0_i32_0 = arith.constant 0 : i32
    return %c0_i32, %arg0 : i32, i32
  }
}

</mosaic_0001>

<bundles_post_ra>
// kernel: tpu_custom_call.1
= control target key start
LH: loop header
LB: loop body
LE: loop exit
PB: predicated region body
PF: predicated region fallthrough
CT: control target
= control target key end

     0   :  { %6 = vsyncpa [#allocation3], 0  ;;  %s129_s0 = inlined_call_operand.hbm [shape: f32[8,32], index: 0, kind: input, shape index: {}]   ;;  %s130_s1 = inlined_call_operand.hbm [shape: f32[8,32], index: 1, kind: output, shape index: {}]  }
   0x1   :  { %7 = vsyncpa [#allocation4], 0  ;;  %s108_s6 = smov [#allocation2]  }
   0x2   :  { %s14_s7 = sshll.u32 %s108_s6, 4  ;;  %s15_s7 = int_to_ptr.vmem [resolvable:$true] %s14_s7 }
   0x3   :  { %s72_s8 = scalar_lea.vmem %s15_s7, 128  ;;  %p77_p1 = scmp.lt.s32.totalorder %s15_s7, %s15_s7 }
   0x4   :  { %p73_p0 = scmp.ne.s32.totalorder %s15_s7, %s72_s8  ;;  %p78_p2 = scmp.lt.s32.totalorder %s72_s8, %s72_s8 }
   0x6   :  { %p79_p3 = por %p78_p2, %p77_p1 }
   0x8   :  { %p80_p4 = pnand %p79_p3, %p73_p0 }
   0xa   :  { %83 = shalt.err (!%p80_p4)
}
   0xb   :  { %17 = dma.hbm_to_vmem [thread:$0]  %s129_s0, 128, %s15_s7, [#allocation3]  }
   0xc   :  { %104 = dma.done.wait [#allocation3], 128  }
   0xd   :  { %105 = vsyncadd [#allocation3], 4294967168  ;;  %vm22_vm0 = vcmask 261120   ;;  %v21_v0 = vld [vmem:[#allocation2] sm:$0xff]  ;;  %s109_s0 = smov [#allocation5]  }
   0xe   :  { %v23_v1 = vsel %vm22_vm0, %v21_v0, -inf  ;;  %s49_s11 = sshll.u32 %s109_s0, 4  ;;  %s50_s11 = int_to_ptr.vmem [resolvable:$true] %s49_s11 }
   0xf   :  { %v24_v2 = vrot.slane %v23_v1, 4  ;;  %s84_s12 = scalar_lea.vmem %s50_s11, 128  ;;  %p89_p6 = scmp.lt.s32.totalorder %s50_s11, %s50_s11 }
  0x10   :  { %p85_p5 = scmp.ne.s32.totalorder %s50_s11, %s84_s12  ;;  %p90_p7 = scmp.lt.s32.totalorder %s84_s12, %s84_s12 }
  0x11   :  { %v25_v3 = vmax.f32 %v23_v1, %v24_v2 }
  0x12   :  { %p91_p8 = por %p90_p7, %p89_p6 }
  0x13   :  { %v26_v4 = vrot.slane %v25_v3, 2 }
  0x14   :  { %p92_p9 = pnand %p91_p8, %p85_p5 }
  0x15   :  { %v27_v5 = vmax.f32 %v25_v3, %v26_v4 }
  0x17   :  { %v28_v6 = vrot.slane %v27_v5, 1 }
  0x19   :  { %v29_v7 = vmax.f32 %v27_v5, %v28_v6 }
  0x1b   :  { %v30_v8 = vsub.f32 %v21_v0, %v29_v7 }
  0x1d   :  { %v31_v9 = vmul.f32 1.442695, %v30_v8 }
  0x1f   :  { %60 = vpow2.f32 %v31_v9 }
  0x2c   :  { %v61_v10 = vpop.eup %60 }
  0x2d   :  { %v33_v11 = vsel %vm22_vm0, %v61_v10, 0.0 }
  0x2e   :  { %v34_v12 = vrot.slane %v33_v11, 4 }
  0x30   :  { %v35_v13 = vadd.f32 %v34_v12, %v33_v11 }
  0x32   :  { %v36_v14 = vrot.slane %v35_v13, 2 }
  0x34   :  { %v37_v15 = vadd.f32 %v36_v14, %v35_v13 }
  0x36   :  { %v38_v16 = vrot.slane %v37_v15, 1 }
  0x38   :  { %v39_v17 = vadd.f32 %v38_v16, %v37_v15 }
  0x3a   :  { %62 = vrcp.f32 %v39_v17 }
  0x47   :  { %v63_v18 = vpop.eup %62 }
  0x48   :  { %v41_v19 = vmul.f32 %v63_v18, %v61_v10 }
  0x4a   :  { %42 = vst.msk [vmem:[#allocation5] sm:$0xff] %vm22_vm0, %v41_v19 }
  0x4b   :  { %95 = shalt.err (!%p92_p9)
}
  0x4c   :  { %52 = dma.vmem_to_hbm [thread:$0]  %s50_s11, 128, %s130_s1, [#allocation4]  }
  0x4d   :  { %106 = dma.done.wait [#allocation4], 128  }
  0x4e   :  { %107 = vsyncadd [#allocation4], 4294967168 }
  0x4f   :  { %56 = vsyncpa [#allocation3], 1 }
  0x50   :  { %57 = vsyncpa [#allocation4], 1 }

</bundles_post_ra>
